<compile_context>
chip_gen: v7x
topology: tpu7x:2x2x1
jax: 0.10.0
libtpu: 0.0.40
codegen_flags: <defaults>
</compile_context>

<pallas_src>
import functools

import jax
import jax.numpy as jnp
from jax import lax
from jax.experimental import pallas as pl
from jax.experimental.pallas import tpu as pltpu


def _round_up(x: int, m: int) -> int:
    return ((x + m - 1) // m) * m


def _pick_tile(dim: int, align: int, cap: int):
    """Return (tile, padded_dim).

    Preference order:
      1. full-dim block (no padding, no alignment requirement),
      2. an aligned tile that divides the dim exactly (no padding, >= cap/2),
      3. the largest aligned tile <= cap, with zero padding up to a multiple.
    """
    if dim <= cap:
        return dim, dim
    max_tile = (cap // align) * align
    best = 0
    t = max_tile
    while t >= align:
        if dim % t == 0:
            best = t
            break
        t -= align
    if best and 2 * best >= max_tile:
        return best, dim
    return max_tile, _round_up(dim, max_tile)


def _linear_kernel_fused(x_ref, w_ref, b_ref, o_ref):
    # Single-K-block fast path: y_tile = x_tile @ W_tile^T + b_tile.
    acc = lax.dot_general(
        x_ref[...],
        w_ref[...],
        dimension_numbers=(((1,), (1,)), ((), ())),   # contract x dim1 with W dim1
        preferred_element_type=jnp.float32,
    )
    o_ref[...] = (acc + b_ref[...]).astype(o_ref.dtype)


def _linear_kernel_acc(x_ref, w_ref, b_ref, o_ref, acc_ref):
    # x_ref: (tm, tk), w_ref: (tn, tk) in PyTorch (out, in) layout, b_ref: (1, tn),
    # o_ref: (tm, tn) resident across the K axis, acc_ref: (tm, tn) f32 scratch.
    k = pl.program_id(2)

    @pl.when(k == 0)
    def _():
        acc_ref[...] = jnp.zeros_like(acc_ref)

    acc_ref[...] += lax.dot_general(
        x_ref[...],
        w_ref[...],
        dimension_numbers=(((1,), (1,)), ((), ())),
        preferred_element_type=jnp.float32,
    )

    @pl.when(k == pl.num_programs(2) - 1)
    def _():
        # Bias added exactly once, on the final K step; VPU add hides under the MXU.
        o_ref[...] = (acc_ref[...] + b_ref[...]).astype(o_ref.dtype)


@functools.partial(jax.jit, static_argnames=("tm", "tn", "tk"))
def linear_pallas(x, weight, bias, *, tm=None, tn=None, tk=None):
    """x: (..., in_features), weight: (out, in) [PyTorch layout], bias: (out,)."""
    orig_shape = x.shape
    in_f = orig_shape[-1]
    out_f = weight.shape[0]
    x2d = x.reshape(-1, in_f)
    B = x2d.shape[0]

    itemsize = jnp.dtype(x.dtype).itemsize
    sublane = max(8, 32 // itemsize)            # 8 (f32) / 16 (bf16) / 32 (int8/fp8)

    # Generation-aware VMEM budget: ~48 MiB on v7x (64 MiB physical), ~96 MiB on
    # v5e/v6e (128 MiB physical).  Conservative fallback if the query fails.
    try:
        vmem_cap = int(pltpu.get_tpu_info().vmem_capacity_bytes)
    except Exception:
        vmem_cap = 64 * 1024 * 1024
    vmem_limit = min((vmem_cap * 3) // 4, 100 * 1024 * 1024)
    big_vmem = vmem_cap >= (96 << 20)

    # Tile caps: tm prioritized (grid_m == 1 for realistic batches => W streamed
    # once), long K tiles to amortize per-step overhead, wider N on 128 MiB parts.
    # Worst-case footprint (f32, 512x1024x2048 double-buffered) ~30 MiB << budget.
    tm_cap = 512
    tn_cap = 1024 if big_vmem else 512
    tk_cap = 2048

    if tm is None:
        tm, Mp = _pick_tile(B, sublane, tm_cap)
    else:
        Mp = _round_up(B, tm)
    if tn is None:
        tn, Np = _pick_tile(out_f, 128, tn_cap)
    else:
        Np = _round_up(out_f, tn)
    if tk is None:
        tk, Kp = _pick_tile(in_f, 128, tk_cap)
    else:
        Kp = _round_up(in_f, tk)

    # Megacore: if the output would be a single block, split it so a "parallel"
    # axis has >= 2 blocks and both v7x TensorCores get work.  Prefer splitting N
    # (re-streams only x); only split when the halves stay lane/sublane aligned.
    if (Mp // tm) * (Np // tn) == 1:
        if tn % 256 == 0:
            tn //= 2
        elif tm % (2 * sublane) == 0:
            tm //= 2

    grid_m, grid_n, grid_k = Mp // tm, Np // tn, Kp // tk

    # Zero padding (K padding contributes exact zeros; M/N padding is sliced off).
    # With the tile choices above this is usually a no-op, so W is never copied.
    pad_m, pad_n, pad_k = Mp - B, Np - out_f, Kp - in_f
    xp = x2d if (pad_m | pad_k) == 0 else jnp.pad(x2d, ((0, pad_m), (0, pad_k)))
    wp = weight if (pad_n | pad_k) == 0 else jnp.pad(weight, ((0, pad_n), (0, pad_k)))
    b2 = bias.reshape(1, out_f)
    bp = b2 if pad_n == 0 else jnp.pad(b2, ((0, 0), (0, pad_n)))

    x_item = jnp.dtype(x.dtype).itemsize
    w_item = jnp.dtype(weight.dtype).itemsize
    cost = pl.CostEstimate(
        flops=2 * Mp * Np * Kp,
        transcendentals=0,
        bytes_accessed=(Mp * Kp * grid_n * x_item        # x re-streamed per N block
                        + Np * Kp * grid_m * w_item      # W re-streamed per M block
                        + Np * jnp.dtype(bias.dtype).itemsize
                        + Mp * Np * x_item),
    )

    if grid_k == 1:
        # Short-K fast path: no accumulator scratch, no k predication.
        out = pl.pallas_call(
            _linear_kernel_fused,
            out_shape=jax.ShapeDtypeStruct((Mp, Np), x.dtype),
            grid_spec=pltpu.PrefetchScalarGridSpec(
                num_scalar_prefetch=0,
                grid=(grid_m, grid_n),
                in_specs=[
                    pl.BlockSpec((tm, tk), lambda i, j: (i, 0)),   # x tile
                    pl.BlockSpec((tn, tk), lambda i, j: (j, 0)),   # W tile (out, in)
                    pl.BlockSpec((1, tn), lambda i, j: (0, j)),    # bias tile
                ],
                out_specs=pl.BlockSpec((tm, tn), lambda i, j: (i, j)),
            ),
            compiler_params=pltpu.CompilerParams(
                dimension_semantics=("parallel", "parallel"),
                vmem_limit_bytes=vmem_limit,
            ),
            cost_estimate=cost,
        )(xp, wp, bp)
    else:
        out = pl.pallas_call(
            _linear_kernel_acc,
            out_shape=jax.ShapeDtypeStruct((Mp, Np), x.dtype),
            grid_spec=pltpu.PrefetchScalarGridSpec(
                num_scalar_prefetch=0,
                grid=(grid_m, grid_n, grid_k),
                in_specs=[
                    pl.BlockSpec((tm, tk), lambda i, j, k: (i, k)),   # x tile
                    pl.BlockSpec((tn, tk), lambda i, j, k: (j, k)),   # W tile (out, in)
                    pl.BlockSpec((1, tn), lambda i, j, k: (0, j)),    # bias tile
                ],
                out_specs=pl.BlockSpec((tm, tn), lambda i, j, k: (i, j)),
                scratch_shapes=[pltpu.VMEM((tm, tn), jnp.float32)],
            ),
            compiler_params=pltpu.CompilerParams(
                dimension_semantics=("parallel", "parallel", "arbitrary"),
                vmem_limit_bytes=vmem_limit,
            ),
            cost_estimate=cost,
        )(xp, wp, bp)

    return out[:B, :out_f].reshape(*orig_shape[:-1], out_f)


if __name__ == "__main__":
    key = jax.random.PRNGKey(0)
    kx, kw, kb = jax.random.split(key, 3)

    batch, in_size, out_size = 2, 32, 32

    # Deterministic parameter init mimicking nn.Linear: U(-1/sqrt(in), 1/sqrt(in))
    bound = 1.0 / jnp.sqrt(jnp.float32(in_size))
    weight = jax.random.uniform(kw, (out_size, in_size), jnp.float32, -bound, bound)
    bias = jax.random.uniform(kb, (out_size,), jnp.float32, -bound, bound)

    x = jax.random.normal(kx, (batch, in_size), jnp.float32)

    y = linear_pallas(x, weight, bias)
    jax.block_until_ready(y)

    # Correctness check against plain-JAX reference (y = x @ W^T + b)
    y_ref = x @ weight.T + bias
    assert y.shape == (batch, out_size)
    assert jnp.allclose(y, y_ref, atol=1e-5, rtol=1e-5)

    print("KERNEL_OK")
</pallas_src>

<mosaic_0001>
module attributes {stable_mosaic.version = 11 : i64} {
  func.func @_linear_kernel_fused(%arg0: i32, %arg1: i32, %arg2: memref<2x32xf32, #tpu.memory_space<vmem>>, %arg3: memref<32x32xf32, #tpu.memory_space<vmem>>, %arg4: memref<1x32xf32, #tpu.memory_space<vmem>>, %arg5: memref<2x32xf32, #tpu.memory_space<vmem>>) attributes {dimension_semantics = [#tpu.dimension_semantics<parallel>, #tpu.dimension_semantics<parallel>], iteration_bounds = array<i64: 1, 1>, scalar_prefetch = 0 : i64, scratch_operands = 0 : i64, tpu.core_type = #tpu.core_type<tc>, window_params = [{transform_indices = @transform_0, window_bounds = array<i64: 2, 32>}, {transform_indices = @transform_1, window_bounds = array<i64: 32, 32>}, {transform_indices = @transform_2, window_bounds = array<i64: 1, 32>}, {transform_indices = @transform_3, window_bounds = array<i64: 2, 32>}]} {
    %c0 = arith.constant 0 : index
    %c0_0 = arith.constant 0 : index
    %0 = vector.load %arg2[%c0, %c0_0] : memref<2x32xf32, #tpu.memory_space<vmem>>, vector<2x32xf32>
    %c0_1 = arith.constant 0 : index
    %c0_2 = arith.constant 0 : index
    %1 = vector.load %arg3[%c0_1, %c0_2] : memref<32x32xf32, #tpu.memory_space<vmem>>, vector<32x32xf32>
    %cst = arith.constant dense<0.000000e+00> : vector<2x32xf32>
    %2 = tpu.matmul %0, %1, %cst {dimension_numbers = #tpu.dot_dimension_numbers<[1], [1], [0], [0], [0, 0, 1, 0], [], []>} : vector<2x32xf32>, vector<32x32xf32>, vector<2x32xf32> -> vector<2x32xf32>
    %c0_3 = arith.constant 0 : index
    %c0_4 = arith.constant 0 : index
    %3 = vector.load %arg4[%c0_3, %c0_4] : memref<1x32xf32, #tpu.memory_space<vmem>>, vector<1x32xf32>
    %4 = vector.broadcast %3 : vector<1x32xf32> to vector<2x32xf32>
    %5 = arith.addf %2, %4 : vector<2x32xf32>
    %c0_5 = arith.constant 0 : index
    %c0_6 = arith.constant 0 : index
    %6 = vector.load %arg5[%c0_5, %c0_6] : memref<2x32xf32, #tpu.memory_space<vmem>>, vector<2x32xf32>
    tpu.vector_store %arg5[%c0_5, %c0_6], %5 {strides = array<i32>} : memref<2x32xf32, #tpu.memory_space<vmem>>, vector<2x32xf32>,
    return
  }
  func.func @transform_0(%arg0: i32, %arg1: i32) -> (i32, i32) {
    %c0_i32 = arith.constant 0 : i32
    %c0_i32_0 = arith.constant 0 : i32
    return %arg0, %c0_i32 : i32, i32
  }
  func.func @transform_1(%arg0: i32, %arg1: i32) -> (i32, i32) {
    %c0_i32 = arith.constant 0 : i32
    %c0_i32_0 = arith.constant 0 : i32
    return %arg1, %c0_i32 : i32, i32
  }
  func.func @transform_2(%arg0: i32, %arg1: i32) -> (i32, i32) {
    %c0_i32 = arith.constant 0 : i32
    %c0_i32_0 = arith.constant 0 : i32
    return %c0_i32, %arg1 : i32, i32
  }
  func.func @transform_3(%arg0: i32, %arg1: i32) -> (i32, i32) {
    %c0_i32 = arith.constant 0 : i32
    return %arg0, %arg1 : i32, i32
  }
}

</mosaic_0001>

<bundles_post_ra>
// kernel: linear_pallas.1
= control target key start
LH: loop header
LB: loop body
LE: loop exit
PB: predicated region body
PF: predicated region fallthrough
CT: control target
= control target key end

     0   :  { %8 = vsyncpa [#allocation3], 0  ;;  %s286_s0 = inlined_call_operand.vmem [shape: f32[2,32], index: 0, kind: input, shape index: {}]   ;;  %s287_s1 = inlined_call_operand.hbm [shape: f32[32,32], index: 1, kind: input, shape index: {}]   ;;  %s288_s2 = inlined_call_operand.vmem [shape: f32[1,32], index: 2, kind: input, shape index: {}]   ;;  %s289_s3 = inlined_call_operand.hbm [shape: f32[2,32], index: 3, kind: output, shape index: {}]  }
   0x1   :  { %9 = vsyncpa [#allocation4], 0  ;;  %s229_s12 = smov [#allocation2]   ;;  %s181_s16 = scalar_lea.hbm %s287_s1, 512 }
   0x2   :  { %s17_s13 = sshll.u32 %s229_s12, 4  ;;  %p182_p0 = scmp.ne.s32.totalorder %s287_s1, %s181_s16  ;;  %s18_s13 = int_to_ptr.vmem [resolvable:$true] %s17_s13 }
   0x3   :  { %p185_p1 = scmp.lt.u32.totalorder %s181_s16, %s287_s1 }
   0x5   :  { %p187_p2 = pnand %p185_p1, %p182_p0 }
   0x7   :  { %190 = shalt.err (!%p187_p2)
}
   0x8   :  { %s191_s21 = scalar_lea.vmem %s18_s13, 512  ;;  %p196_p4 = scmp.lt.s32.totalorder %s18_s13, %s18_s13 }
   0x9   :  { %p192_p3 = scmp.ne.s32.totalorder %s18_s13, %s191_s21  ;;  %p197_p5 = scmp.lt.s32.totalorder %s191_s21, %s191_s21 }
   0xb   :  { %p198_p6 = por %p197_p5, %p196_p4 }
   0xd   :  { %p199_p7 = pnand %p198_p6, %p192_p3 }
   0xf   :  { %202 = shalt.err (!%p199_p7)
}
  0x10   :  { %s230_s22 = smov 128   ;;  %s231_s23 = smov 8  }
  0x11   :  { %23 = dma.hbm_to_vmem [thread:$0]  %s287_s1, 512, %s18_s13, [#allocation3], %s230_s22, %s230_s22, %s231_s23  }
  0x12   :  { %225 = dma.done.wait [#allocation3], 512  }
  0x13   :  { %226 = vsyncadd [#allocation3], 4294966784  ;;  %v232_v0 = vmov 0.0|0.0   ;;  %vm233_vm0 = vmmov 0   ;;  %v234_v1 = vmov 0.0   ;;  %vm41_vm1 = vcmask 261120  }
  0x14   :  { %166 = vmatprep.subr.bf16.mxu0 %v232_v0  ;;  %163 = vmatprep.mubr.msk.f32.mxu0 %vm233_vm0, %v234_v1  ;;  %v30_v2 = vld [vmem:[#allocation2] sm:$0xff]  ;;  %v31_v3 = vld [vmem:[#allocation2 + $0x8] sm:$0xff]  ;;  %vm168_vm2 = vmpackc.low %vm41_vm1, %vm41_vm1  ;;  %s235_s29 = smov [#allocation5]   ;;  %vm127_vm3 = vcmask 254976  }
  0x15   :  { %v167_v4 = vpack.c.bf16 %v31_v3, %v30_v2  ;;  %v32_v5 = vld [vmem:[#allocation2 + $0x10] sm:$0xff]  ;;  %v33_v6 = vld [vmem:[#allocation2 + $0x18] sm:$0xff]  ;;  %v29_v8 = vld [vmem:[%s286_s0] sm:$0x3]  ;;  %s135_s30 = sshll.u32 %s235_s29, 4  ;;  %s136_s30 = int_to_ptr.vmem [resolvable:$true] %s135_s30 }
  0x16   :  { %v171_v7 = vpack.c.bf16 %v33_v6, %v32_v5  ;;  %v144_v9 = vld [vmem:[%s288_s2] ss:$0 sm:$0xff]  ;;  %s203_s4 = scalar_lea.vmem %s136_s30, 32  ;;  %p208_p9 = scmp.lt.s32.totalorder %s136_s30, %s136_s30 }
  0x17   :  { %169 = vmatpush3.bf16.xpose.msk.msra.mxu0 %vm168_vm2, %v167_v4  ;;  %p204_p8 = scmp.ne.s32.totalorder %s136_s30, %s203_s4  ;;  %p209_p10 = scmp.lt.s32.totalorder %s203_s4, %s203_s4 }
  0x18   :  { %170 = vmatprep.subr.bf16.mxu0 %v232_v0 }
  0x19   :  { %p210_p11 = por %p209_p10, %p208_p9 }
  0x1b   :  { %p211_p12 = pnand %p210_p11, %p204_p8 }
  0x1f   :  { %173 = vmatpush3.bf16.xpose.msk.msra.mxu0 %vm168_vm2, %v171_v7 }
  0x26   :  { %164 = vmatmul.mubr.msk.f32.vlgmr.msra.gmra.mrb[0].mxu0 %vm41_vm1, %v29_v8 }
  0xf9   :  { %v123_v10 = vpop.f32.mrb[0].mxu0 }
  0xfa   :  { %v124_v11 = vadd.f32 %v144_v9, %v123_v10  ;;  %v165_v12 = vpop.f32.mrb[1].mxu0 }
  0xfc   :  { %128 = vst.msk [vmem:[#allocation5] sm:$0x3] %vm127_vm3, %v124_v11 }
  0xfd   :  { %214 = shalt.err (!%p211_p12)
}
  0xfe   :  { %s215_s6 = scalar_lea.hbm %s289_s3, 32 }
  0xff   :  { %p216_p13 = scmp.ne.s32.totalorder %s289_s3, %s215_s6  ;;  %p219_p0 = scmp.lt.u32.totalorder %s215_s6, %s289_s3 }
 0x101   :  { %p221_p1 = pnand %p219_p0, %p216_p13 }
 0x103   :  { %224 = shalt.err (!%p221_p1)
}
 0x104   :  { %138 = dma.vmem_to_hbm [thread:$0]  %s136_s30, 32, %s289_s3, [#allocation4]  }
 0x105   :  { %227 = dma.done.wait [#allocation4], 32  }
 0x106   :  { %228 = vsyncadd [#allocation4], 4294967264 }
 0x107   :  { %142 = vsyncpa [#allocation3], 1 }
 0x108   :  { %143 = vsyncpa [#allocation4], 1 }

</bundles_post_ra>
